<compile_context>
chip_gen: v6e
topology: v6e:2x2x1
jax: 0.10.0
libtpu: 0.0.40
codegen_flags: <defaults>
</compile_context>

<pallas_src>
import functools

import jax
import jax.numpy as jnp
from jax.experimental import pallas as pl
from jax.experimental.pallas import tpu as pltpu


def _policy_kernel(x_ref, win_ref, br_ref, w1s_ref, b1_ref, w2_ref, b2_ref,
                   state_ref, logits_ref, *, r_p):
    # x: (TB, IN_P) padded [obs | agent_ids] tile.
    x = x_ref[...]

    # One MXU push: y[:, :r_p]  = obs @ W_repr   (repr pre-activation)
    #               y[:, r_p:]  = ids @ W1_ids   (ids contribution to hidden)
    y = jnp.dot(x, win_ref[...], preferred_element_type=jnp.float32)

    # representation: Linear + ReLU  (padded lanes stay exactly 0)
    state = jnp.maximum(y[:, :r_p] + br_ref[...], 0.0)
    state_ref[...] = state.astype(state_ref.dtype)

    # actor hidden: ReLU(concat([state, ids]) @ W1 + b1) via split matmul
    h = jnp.dot(state.astype(w1s_ref.dtype), w1s_ref[...],
                preferred_element_type=jnp.float32)
    h = jnp.maximum(h + y[:, r_p:] + b1_ref[...], 0.0)

    # actor output layer -> categorical logits
    logits = jnp.dot(h.astype(w2_ref.dtype), w2_ref[...],
                     preferred_element_type=jnp.float32)
    logits_ref[...] = (logits + b2_ref[...]).astype(logits_ref.dtype)


def mean_field_actor_forward(obs, agent_ids, params, *,
                             compute_dtype=jnp.float32, batch_tile=512):
    """Fused forward pass. Returns (state, logits) in float32."""
    B, obs_dim = obs.shape
    n_agents = agent_ids.shape[-1]
    repr_dim = params["W_repr"].shape[1]
    hidden = params["W1_state"].shape[1]
    action_dim = params["W2"].shape[1]

    LANE, SUB = 128, 8
    rup = lambda x, m: (x + m - 1) // m * m

    in_dim = obs_dim + n_agents
    IN_P = rup(in_dim, LANE)
    R_P = rup(repr_dim, LANE)
    H_P = rup(hidden, LANE)
    A_P = rup(action_dim, LANE)

    # Batch tile: multiple of 8 sublanes, sized well under v7x's 32 MiB scoped
    # VMEM even with double-buffered input + two output streams.
    B_pad = rup(B, SUB)
    TB = rup(min(batch_tile, B_pad), SUB)
    B_pad = rup(B_pad, TB)
    grid = (B_pad // TB,)

    cd = compute_dtype

    # Fused, lane-dense input stream: [obs | agent_ids] zero-padded to IN_P.
    x_in = jnp.zeros((B_pad, IN_P), cd)
    x_in = x_in.at[:B, :obs_dim].set(obs.astype(cd))
    x_in = x_in.at[:B, obs_dim:in_dim].set(agent_ids.astype(cd))

    # Combined first-layer weight: columns [0, R_P) are W_repr (fed by the obs
    # lanes), columns [R_P, R_P+H_P) are W1_ids (fed by the id lanes). All
    # other entries are zero, so padded lanes contribute nothing.
    W_in = jnp.zeros((IN_P, R_P + H_P), cd)
    W_in = W_in.at[:obs_dim, :repr_dim].set(params["W_repr"].astype(cd))
    W_in = W_in.at[obs_dim:in_dim, R_P:R_P + hidden].set(
        params["W1_ids"].astype(cd))

    W1s = jnp.zeros((R_P, H_P), cd).at[:repr_dim, :hidden].set(
        params["W1_state"].astype(cd))
    W2 = jnp.zeros((H_P, A_P), cd).at[:hidden, :action_dim].set(
        params["W2"].astype(cd))

    br = jnp.zeros((1, R_P), jnp.float32).at[:, :repr_dim].set(
        params["b_repr"].astype(jnp.float32))
    b1 = jnp.zeros((1, H_P), jnp.float32).at[:, :hidden].set(
        params["b1"].astype(jnp.float32))
    b2 = jnp.zeros((1, A_P), jnp.float32).at[:, :action_dim].set(
        params["b2"].astype(jnp.float32))

    # Streamed tensors are tiled on the batch axis; weights/biases always map
    # to block (0, 0) so they stay resident in VMEM across the whole grid.
    batch_spec = lambda feat: pl.BlockSpec((TB, feat), lambda i: (i, 0))
    resident = lambda shape: pl.BlockSpec(shape, lambda i: (0, 0))

    itemsize = jnp.dtype(cd).itemsize
    flops = int(2 * B_pad * (IN_P * (R_P + H_P) + R_P * H_P + H_P * A_P))
    bytes_accessed = int(
        B_pad * IN_P * itemsize                       # streamed input
        + B_pad * (R_P + A_P) * 4                     # streamed outputs (f32)
        + (IN_P * (R_P + H_P) + R_P * H_P + H_P * A_P) * itemsize
        + (R_P + H_P + A_P) * 4)                      # weights + biases

    state_p, logits_p = pl.pallas_call(
        functools.partial(_policy_kernel, r_p=R_P),
        out_shape=(
            jax.ShapeDtypeStruct((B_pad, R_P), jnp.float32),
            jax.ShapeDtypeStruct((B_pad, A_P), jnp.float32),
        ),
        grid=grid,
        in_specs=[
            batch_spec(IN_P),
            resident((IN_P, R_P + H_P)),
            resident((1, R_P)),
            resident((R_P, H_P)),
            resident((1, H_P)),
            resident((H_P, A_P)),
            resident((1, A_P)),
        ],
        out_specs=(
            batch_spec(R_P),
            batch_spec(A_P),
        ),
        compiler_params=pltpu.CompilerParams(
            dimension_semantics=("parallel",),
            vmem_limit_bytes=32 * 1024 * 1024,
        ),
        cost_estimate=pl.CostEstimate(
            flops=flops, transcendentals=0, bytes_accessed=bytes_accessed),
    )(x_in, W_in, br, W1s, b1, W2, b2)

    # Slice padded lanes / rows back off outside the kernel.
    return state_p[:B, :repr_dim], logits_p[:B, :action_dim]


def _reference_forward(obs, agent_ids, params):
    state = jnp.maximum(obs @ params["W_repr"] + params["b_repr"], 0.0)
    x = jnp.concatenate([state, agent_ids], axis=-1)
    w1 = jnp.concatenate([params["W1_state"], params["W1_ids"]], axis=0)
    h = jnp.maximum(x @ w1 + params["b1"], 0.0)
    logits = h @ params["W2"] + params["b2"]
    return state, logits


if __name__ == "__main__":
    # Small shapes consistent with the module:
    n_agents = 8
    n_envs = 1
    B = n_envs * n_agents          # batch of per-agent observations
    obs_dim = 16                   # observation feature dim
    repr_dim = 32                  # representation.output_shapes['state'][0]
    hidden = 32                    # actor_hidden_size = [32]
    action_dim = 8                 # action_space.n

    key = jax.random.PRNGKey(0)
    k_obs, k_wr, k_w1, k_w2 = jax.random.split(key, 4)

    observation = jax.random.normal(k_obs, (B, obs_dim), dtype=jnp.float32)
    # agent one-hot ids (each env contributes one row per agent)
    agent_ids = jnp.tile(jnp.eye(n_agents, dtype=jnp.float32), (n_envs, 1))

    w1_full = jax.random.normal(k_w1, (repr_dim + n_agents, hidden), jnp.float32) * 0.1
    params = {
        "W_repr": jax.random.normal(k_wr, (obs_dim, repr_dim), jnp.float32) * 0.1,
        "b_repr": jnp.zeros((1, repr_dim), jnp.float32),
        "W1_state": w1_full[:repr_dim],
        "W1_ids": w1_full[repr_dim:],
        "b1": jnp.zeros((1, hidden), jnp.float32),
        "W2": jax.random.normal(k_w2, (hidden, action_dim), jnp.float32) * 0.1,
        "b2": jnp.zeros((1, action_dim), jnp.float32),
    }

    state_ref, logits_ref = _reference_forward(observation, agent_ids, params)

    # f32 path (exact check).
    state, logits = mean_field_actor_forward(observation, agent_ids, params,
                                             compute_dtype=jnp.float32)
    jax.block_until_ready((state, logits))
    assert state.shape == (B, repr_dim) and logits.shape == (B, action_dim)
    assert jnp.allclose(state, state_ref, atol=1e-5), "state mismatch (f32)"
    assert jnp.allclose(logits, logits_ref, atol=1e-5), "logits mismatch (f32)"

    # bf16 streaming path (recommended on v6e/v7x): f32 accumulation, loose tol.
    state_bf, logits_bf = mean_field_actor_forward(observation, agent_ids, params,
                                                   compute_dtype=jnp.bfloat16)
    jax.block_until_ready((state_bf, logits_bf))
    assert jnp.allclose(state_bf, state_ref, atol=5e-2, rtol=5e-2), "state mismatch (bf16)"
    assert jnp.allclose(logits_bf, logits_ref, atol=5e-2, rtol=5e-2), "logits mismatch (bf16)"

    print("KERNEL_OK")
</pallas_src>

<mosaic_0001>
module attributes {stable_mosaic.version = 11 : i64} {
  func.func @_policy_kernel(%arg0: i32, %arg1: memref<8x128xf32, #tpu.memory_space<vmem>>, %arg2: memref<128x256xf32, #tpu.memory_space<vmem>>, %arg3: memref<1x128xf32, #tpu.memory_space<vmem>>, %arg4: memref<128x128xf32, #tpu.memory_space<vmem>>, %arg5: memref<1x128xf32, #tpu.memory_space<vmem>>, %arg6: memref<128x128xf32, #tpu.memory_space<vmem>>, %arg7: memref<1x128xf32, #tpu.memory_space<vmem>>, %arg8: memref<8x128xf32, #tpu.memory_space<vmem>>, %arg9: memref<8x128xf32, #tpu.memory_space<vmem>>) attributes {dimension_semantics = [#tpu.dimension_semantics<parallel>], iteration_bounds = array<i64: 1>, scalar_prefetch = 0 : i64, scratch_operands = 0 : i64, tpu.core_type = #tpu.core_type<tc>, window_params = [{transform_indices = @transform_0, window_bounds = array<i64: 8, 128>}, {pipeline_mode = #tpu.pipeline_mode<synchronous>, transform_indices = @transform_1, window_bounds = array<i64: 128, 256>}, {pipeline_mode = #tpu.pipeline_mode<synchronous>, transform_indices = @transform_2, window_bounds = array<i64: 1, 128>}, {pipeline_mode = #tpu.pipeline_mode<synchronous>, transform_indices = @transform_3, window_bounds = array<i64: 128, 128>}, {pipeline_mode = #tpu.pipeline_mode<synchronous>, transform_indices = @transform_4, window_bounds = array<i64: 1, 128>}, {pipeline_mode = #tpu.pipeline_mode<synchronous>, transform_indices = @transform_5, window_bounds = array<i64: 128, 128>}, {pipeline_mode = #tpu.pipeline_mode<synchronous>, transform_indices = @transform_6, window_bounds = array<i64: 1, 128>}, {transform_indices = @transform_7, window_bounds = array<i64: 8, 128>}, {transform_indices = @transform_8, window_bounds = array<i64: 8, 128>}]} {
    %c0 = arith.constant 0 : index
    %c0_0 = arith.constant 0 : index
    %0 = vector.load %arg1[%c0, %c0_0] : memref<8x128xf32, #tpu.memory_space<vmem>>, vector<8x128xf32>
    %c0_1 = arith.constant 0 : index
    %c0_2 = arith.constant 0 : index
    %1 = vector.load %arg2[%c0_1, %c0_2] : memref<128x256xf32, #tpu.memory_space<vmem>>, vector<128x256xf32>
    %cst = arith.constant dense<0.000000e+00> : vector<8x256xf32>
    %2 = tpu.matmul %0, %1, %cst {dimension_numbers = #tpu.dot_dimension_numbers<[1], [0], [0], [1], [0, 0, 1, 1], [], []>} : vector<8x128xf32>, vector<128x256xf32>, vector<8x256xf32> -> vector<8x256xf32>
    %3 = vector.extract_strided_slice %2 {offsets = [0, 0], sizes = [8, 128], strides = [1, 1]} : vector<8x256xf32> to vector<8x128xf32>
    %c0_3 = arith.constant 0 : index
    %c0_4 = arith.constant 0 : index
    %4 = vector.load %arg3[%c0_3, %c0_4] : memref<1x128xf32, #tpu.memory_space<vmem>>, vector<1x128xf32>
    %5 = vector.broadcast %4 : vector<1x128xf32> to vector<8x128xf32>
    %6 = arith.addf %3, %5 : vector<8x128xf32>
    %cst_5 = arith.constant 0.000000e+00 : f32
    %7 = vector.broadcast %cst_5 : f32 to vector<8x128xf32>
    %8 = arith.maximumf %6, %7 : vector<8x128xf32>
    %c0_6 = arith.constant 0 : index
    %c0_7 = arith.constant 0 : index
    %9 = vector.load %arg8[%c0_6, %c0_7] : memref<8x128xf32, #tpu.memory_space<vmem>>, vector<8x128xf32>
    tpu.vector_store %arg8[%c0_6, %c0_7], %8 {strides = array<i32>} : memref<8x128xf32, #tpu.memory_space<vmem>>, vector<8x128xf32>,
    %c0_8 = arith.constant 0 : index
    %c0_9 = arith.constant 0 : index
    %10 = vector.load %arg4[%c0_8, %c0_9] : memref<128x128xf32, #tpu.memory_space<vmem>>, vector<128x128xf32>
    %cst_10 = arith.constant dense<0.000000e+00> : vector<8x128xf32>
    %11 = tpu.matmul %8, %10, %cst_10 {dimension_numbers = #tpu.dot_dimension_numbers<[1], [0], [0], [1], [0, 0, 1, 1], [], []>} : vector<8x128xf32>, vector<128x128xf32>, vector<8x128xf32> -> vector<8x128xf32>
    %12 = vector.extract_strided_slice %2 {offsets = [0, 128], sizes = [8, 128], strides = [1, 1]} : vector<8x256xf32> to vector<8x128xf32>
    %13 = arith.addf %11, %12 : vector<8x128xf32>
    %c0_11 = arith.constant 0 : index
    %c0_12 = arith.constant 0 : index
    %14 = vector.load %arg5[%c0_11, %c0_12] : memref<1x128xf32, #tpu.memory_space<vmem>>, vector<1x128xf32>
    %15 = vector.broadcast %14 : vector<1x128xf32> to vector<8x128xf32>
    %16 = arith.addf %13, %15 : vector<8x128xf32>
    %cst_13 = arith.constant 0.000000e+00 : f32
    %17 = vector.broadcast %cst_13 : f32 to vector<8x128xf32>
    %18 = arith.maximumf %16, %17 : vector<8x128xf32>
    %c0_14 = arith.constant 0 : index
    %c0_15 = arith.constant 0 : index
    %19 = vector.load %arg6[%c0_14, %c0_15] : memref<128x128xf32, #tpu.memory_space<vmem>>, vector<128x128xf32>
    %cst_16 = arith.constant dense<0.000000e+00> : vector<8x128xf32>
    %20 = tpu.matmul %18, %19, %cst_16 {dimension_numbers = #tpu.dot_dimension_numbers<[1], [0], [0], [1], [0, 0, 1, 1], [], []>} : vector<8x128xf32>, vector<128x128xf32>, vector<8x128xf32> -> vector<8x128xf32>
    %c0_17 = arith.constant 0 : index
    %c0_18 = arith.constant 0 : index
    %21 = vector.load %arg7[%c0_17, %c0_18] : memref<1x128xf32, #tpu.memory_space<vmem>>, vector<1x128xf32>
    %22 = vector.broadcast %21 : vector<1x128xf32> to vector<8x128xf32>
    %23 = arith.addf %20, %22 : vector<8x128xf32>
    %c0_19 = arith.constant 0 : index
    %c0_20 = arith.constant 0 : index
    %24 = vector.load %arg9[%c0_19, %c0_20] : memref<8x128xf32, #tpu.memory_space<vmem>>, vector<8x128xf32>
    tpu.vector_store %arg9[%c0_19, %c0_20], %23 {strides = array<i32>} : memref<8x128xf32, #tpu.memory_space<vmem>>, vector<8x128xf32>,
    return
  }
  func.func @transform_0(%arg0: i32) -> (i32, i32) {
    %c0_i32 = arith.constant 0 : i32
    %c0_i32_0 = arith.constant 0 : i32
    return %arg0, %c0_i32 : i32, i32
  }
  func.func @transform_1(%arg0: i32) -> (i32, i32) {
    %c0_i32 = arith.constant 0 : i32
    %c0_i32_0 = arith.constant 0 : i32
    %c0_i32_1 = arith.constant 0 : i32
    return %c0_i32, %c0_i32_0 : i32, i32
  }
  func.func @transform_2(%arg0: i32) -> (i32, i32) {
    %c0_i32 = arith.constant 0 : i32
    %c0_i32_0 = arith.constant 0 : i32
    %c0_i32_1 = arith.constant 0 : i32
    return %c0_i32, %c0_i32_0 : i32, i32
  }
  func.func @transform_3(%arg0: i32) -> (i32, i32) {
    %c0_i32 = arith.constant 0 : i32
    %c0_i32_0 = arith.constant 0 : i32
    %c0_i32_1 = arith.constant 0 : i32
    return %c0_i32, %c0_i32_0 : i32, i32
  }
  func.func @transform_4(%arg0: i32) -> (i32, i32) {
    %c0_i32 = arith.constant 0 : i32
    %c0_i32_0 = arith.constant 0 : i32
    %c0_i32_1 = arith.constant 0 : i32
    return %c0_i32, %c0_i32_0 : i32, i32
  }
  func.func @transform_5(%arg0: i32) -> (i32, i32) {
    %c0_i32 = arith.constant 0 : i32
    %c0_i32_0 = arith.constant 0 : i32
    %c0_i32_1 = arith.constant 0 : i32
    return %c0_i32, %c0_i32_0 : i32, i32
  }
  func.func @transform_6(%arg0: i32) -> (i32, i32) {
    %c0_i32 = arith.constant 0 : i32
    %c0_i32_0 = arith.constant 0 : i32
    %c0_i32_1 = arith.constant 0 : i32
    return %c0_i32, %c0_i32_0 : i32, i32
  }
  func.func @transform_7(%arg0: i32) -> (i32, i32) {
    %c0_i32 = arith.constant 0 : i32
    %c0_i32_0 = arith.constant 0 : i32
    return %arg0, %c0_i32 : i32, i32
  }
  func.func @transform_8(%arg0: i32) -> (i32, i32) {
    %c0_i32 = arith.constant 0 : i32
    %c0_i32_0 = arith.constant 0 : i32
    return %arg0, %c0_i32 : i32, i32
  }
}

</mosaic_0001>

<bundles_post_ra>
// kernel: tpu_custom_call.1
= control target key start
LH: loop header
LB: loop body
LE: loop exit
PB: predicated region body
PF: predicated region fallthrough
CT: control target
= control target key end

     0   :  { %14 = vsyncpa [#allocation3], 0  ;;  %s785_s0 = inlined_call_operand.hbm [shape: f32[8,128], index: 0, kind: input, shape index: {}]   ;;  %s786_s1 = inlined_call_operand.hbm [shape: f32[128,256], index: 1, kind: input, shape index: {}]   ;;  %s787_s2 = inlined_call_operand.vmem [shape: f32[1,128], index: 2, kind: input, shape index: {}]   ;;  %s788_s3 = inlined_call_operand.hbm [shape: f32[128,128], index: 3, kind: input, shape index: {}]   ;;  %s789_s4 = inlined_call_operand.vmem [shape: f32[1,128], index: 4, kind: input, shape index: {}]   ;;  %s790_s5 = inlined_call_operand.hbm [shape: f32[128,128], index: 5, kind: input, shape index: {}]   ;;  %s791_s6 = inlined_call_operand.vmem [shape: f32[1,128], index: 6, kind: input, shape index: {}]   ;;  %s792_s7 = inlined_call_operand.hbm [shape: f32[8,128], index: 7, kind: output, shape index: {0}]   ;;  %s793_s8 = inlined_call_operand.hbm [shape: f32[8,128], index: 8, kind: output, shape index: {1}]  }
   0x1   :  { %15 = vsyncpa [#allocation6], 0 }
   0x2   :  { %16 = vsyncpa [#allocation9], 0 }
   0x3   :  { %17 = vsyncpa [#allocation4], 0 }
   0x4   :  { %18 = vsyncpa [#allocation12], 0  ;;  %s666_s27 = smov [#allocation5]  }
   0x5   :  { %s34_s28 = sshll.u32 %s666_s27, 4  ;;  %s35_s28 = int_to_ptr.vmem [resolvable:$true] %s34_s28 }
   0x6   :  { %s544_s29 = scalar_lea.vmem %s35_s28, 4096  ;;  %p549_p1 = scmp.lt.s32.totalorder %s35_s28, %s35_s28 }
   0x7   :  { %p545_p0 = scmp.ne.s32.totalorder %s35_s28, %s544_s29  ;;  %p550_p2 = scmp.lt.s32.totalorder %s544_s29, %s544_s29 }
   0x9   :  { %p551_p3 = por %p550_p2, %p549_p1 }
   0xb   :  { %p552_p4 = pnand %p551_p3, %p545_p0 }
   0xd   :  { %555 = shalt.err (!%p552_p4)
}
   0xe   :  { %s667_s30 = smov 256   ;;  %s668_s9 = smov 16  }
   0xf   :  { %40 = dma.hbm_to_vmem [thread:$0]  %s786_s1, 4096, %s35_s28, [#allocation6], %s667_s30, %s667_s30, %s668_s9  }
  0x10   :  { %s669_s12 = smov [#allocation2]   ;;  %s670_s14 = smov [#allocation7]  }
  0x11   :  { %s25_s13 = sshll.u32 %s669_s12, 4  ;;  %s48_s15 = sshll.u32 %s670_s14, 4  ;;  %s26_s13 = int_to_ptr.vmem [resolvable:$true] %s25_s13  ;;  %s49_s15 = int_to_ptr.vmem [resolvable:$true] %s48_s15 }
  0x12   :  { %s564_s16 = scalar_lea.vmem %s26_s13, 128  ;;  %p569_p6 = scmp.lt.s32.totalorder %s26_s13, %s26_s13 }
  0x13   :  { %p565_p5 = scmp.ne.s32.totalorder %s26_s13, %s564_s16  ;;  %p570_p7 = scmp.lt.s32.totalorder %s564_s16, %s564_s16 }
  0x15   :  { %p571_p8 = por %p570_p7, %p569_p6 }
  0x17   :  { %p572_p9 = pnand %p571_p8, %p565_p5 }
  0x19   :  { %575 = shalt.err (!%p572_p9)
}
  0x1a   :  { %28 = dma.hbm_to_vmem [thread:$0]  %s785_s0, 128, %s26_s13, [#allocation3]  }
  0x1b   :  { %s584_s19 = scalar_lea.vmem %s49_s15, 2048  ;;  %p589_p11 = scmp.lt.s32.totalorder %s49_s15, %s49_s15 }
  0x1c   :  { %p585_p10 = scmp.ne.s32.totalorder %s49_s15, %s584_s19  ;;  %p590_p12 = scmp.lt.s32.totalorder %s584_s19, %s584_s19 }
  0x1e   :  { %p591_p13 = por %p590_p12, %p589_p11 }
  0x20   :  { %p592_p0 = pnand %p591_p13, %p585_p10 }
  0x22   :  { %595 = shalt.err (!%p592_p0)
}
  0x23   :  { %s671_s1 = smov 128   ;;  %s672_s20 = smov 8  }
  0x24   :  { %54 = dma.hbm_to_vmem [thread:$0]  %s788_s3, 2048, %s49_s15, [#allocation6], %s671_s1, %s671_s1, %s672_s20  }
  0x25   :  { %s673_s23 = smov [#allocation8]  }
  0x26   :  { %s62_s24 = sshll.u32 %s673_s23, 4  ;;  %s63_s24 = int_to_ptr.vmem [resolvable:$true] %s62_s24 }
  0x27   :  { %s604_s25 = scalar_lea.vmem %s63_s24, 2048  ;;  %p609_p2 = scmp.lt.s32.totalorder %s63_s24, %s63_s24 }
  0x28   :  { %p605_p1 = scmp.ne.s32.totalorder %s63_s24, %s604_s25  ;;  %p610_p3 = scmp.lt.s32.totalorder %s604_s25, %s604_s25 }
  0x2a   :  { %p611_p4 = por %p610_p3, %p609_p2 }
  0x2c   :  { %p612_p5 = pnand %p611_p4, %p605_p1 }
  0x2e   :  { %615 = shalt.err (!%p612_p5)
}
  0x2f   :  { %68 = dma.hbm_to_vmem [thread:$0]  %s790_s5, 2048, %s63_s24, [#allocation9], %s671_s1, %s671_s1, %s672_s20  }
  0x30   :  { %656 = dma.done.wait [#allocation3], 128  }
  0x31   :  { %657 = vsyncadd [#allocation3], 4294967168 }
  0x32   :  { %658 = dma.done.wait [#allocation6], 6144  }
  0x33   :  { %659 = vsyncadd [#allocation6], 4294961152 }
  0x34   :  { %660 = dma.done.wait [#allocation9], 2048  }
  0x35   :  { %661 = vsyncadd [#allocation9], 4294965248  ;;  %v674_v0 = vmov 0.0   ;;  %v115_v1 = vld [vmem:[#allocation5 + $0xf8] sm:$0xff]  ;;  %v114_v2 = vld [vmem:[#allocation5 + $0xf0] sm:$0xff]  ;;  %vm675_vm0 = vmmov 0  }
  0x36   :  { %180 = vmatprep.mubr.f32.mxu0 %v674_v0  ;;  %454 = vmatprep.subr.mxu1 %v674_v0  ;;  %v113_v3 = vld [vmem:[#allocation5 + $0xe8] sm:$0xff]  ;;  %v112_v4 = vld [vmem:[#allocation5 + $0xe0] sm:$0xff]  ;;  %v111_v5 = vld [vmem:[#allocation5 + $0xd8] sm:$0xff]  ;;  %s676_s28 = smov [#allocation10]  }
  0x37   :  { %116 = vmatprep.subr.mxu0 %v115_v1  ;;  %v110_v6 = vld [vmem:[#allocation5 + $0xd0] sm:$0xff]  ;;  %v109_v7 = vld [vmem:[#allocation5 + $0xc8] sm:$0xff]  ;;  %v108_v8 = vld [vmem:[#allocation5 + $0xc0] sm:$0xff]  ;;  %486 = vmatprep.mubr.msk.f32.mxu1 %vm675_vm0, %v674_v0  ;;  %s392_s29 = sshll.u32 %s676_s28, 4  ;;  %s393_s29 = int_to_ptr.vmem [resolvable:$true] %s392_s29 }
  0x38   :  { %117 = vmatpush1.msra.mxu0 %v114_v2  ;;  %v107_v9 = vld [vmem:[#allocation5 + $0xb8] sm:$0xff]  ;;  %v106_v10 = vld [vmem:[#allocation5 + $0xb0] sm:$0xff]  ;;  %v105_v11 = vld [vmem:[#allocation5 + $0xa8] sm:$0xff]  ;;  %s616_s30 = scalar_lea.vmem %s393_s29, 128  ;;  %p621_p7 = scmp.lt.s32.totalorder %s393_s29, %s393_s29 }
  0x39   :  { %118 = vmatprep.subr.mxu0 %v113_v3  ;;  %v104_v12 = vld [vmem:[#allocation5 + $0xa0] sm:$0xff]  ;;  %v103_v13 = vld [vmem:[#allocation5 + $0x98] sm:$0xff]  ;;  %v102_v14 = vld [vmem:[#allocation5 + $0x90] sm:$0xff]  ;;  %p617_p6 = scmp.ne.s32.totalorder %s393_s29, %s616_s30  ;;  %p622_p8 = scmp.lt.s32.totalorder %s616_s30, %s616_s30 }
  0x3a   :  { %119 = vmatpush1.msra.mxu0 %v112_v4  ;;  %v212_v15 = vld [vmem:[#allocation7 + $0x78] sm:$0xff]  ;;  %v211_v16 = vld [vmem:[#allocation7 + $0x70] sm:$0xff]  ;;  %v101_v17 = vld [vmem:[#allocation5 + $0x88] sm:$0xff] }
  0x3b   :  { %120 = vmatprep.subr.mxu0 %v111_v5  ;;  %455 = vmatpush3.msra.mxu1 %v212_v15  ;;  %v100_v18 = vld [vmem:[#allocation5 + $0x80] sm:$0xff]  ;;  %v210_v19 = vld [vmem:[#allocation7 + $0x68] sm:$0xff]  ;;  %v99_v20 = vld [vmem:[#allocation5 + $0x78] sm:$0xff]  ;;  %p623_p9 = por %p622_p8, %p621_p7 }
  0x3c   :  { %121 = vmatpush1.msra.mxu0 %v110_v6  ;;  %456 = vmatprep.subr.mxu1 %v674_v0  ;;  %v98_v21 = vld [vmem:[#allocation5 + $0x70] sm:$0xff]  ;;  %v209_v22 = vld [vmem:[#allocation7 + $0x60] sm:$0xff]  ;;  %v97_v23 = vld [vmem:[#allocation5 + $0x68] sm:$0xff] }
  0x3d   :  { %122 = vmatprep.subr.mxu0 %v109_v7  ;;  %457 = vmatpush3.msra.mxu1 %v211_v16  ;;  %v96_v24 = vld [vmem:[#allocation5 + $0x60] sm:$0xff]  ;;  %v208_v25 = vld [vmem:[#allocation7 + $0x58] sm:$0xff]  ;;  %v94_v27 = vld [vmem:[#allocation5 + $0x50] sm:$0xff]  ;;  %p624_p10 = pnand %p623_p9, %p617_p6 }
  0x3e   :  { %123 = vmatpush1.msra.mxu0 %v108_v8  ;;  %458 = vmatprep.subr.mxu1 %v674_v0  ;;  %v95_v26 = vld [vmem:[#allocation5 + $0x58] sm:$0xff]  ;;  %v207_v28 = vld [vmem:[#allocation7 + $0x50] sm:$0xff]  ;;  %v93_v29 = vld [vmem:[#allocation5 + $0x48] sm:$0xff] }
  0x3f   :  { %124 = vmatprep.subr.mxu0 %v107_v9  ;;  %459 = vmatpush3.msra.mxu1 %v210_v19  ;;  %v92_v30 = vld [vmem:[#allocation5 + $0x40] sm:$0xff]  ;;  %v206_v31 = vld [vmem:[#allocation7 + $0x48] sm:$0xff]  ;;  %v91_v32 = vld [vmem:[#allocation5 + $0x38] sm:$0xff] }
  0x40   :  { %125 = vmatpush1.msra.mxu0 %v106_v10  ;;  %460 = vmatprep.subr.mxu1 %v674_v0  ;;  %v90_v33 = vld [vmem:[#allocation5 + $0x30] sm:$0xff]  ;;  %v205_v34 = vld [vmem:[#allocation7 + $0x40] sm:$0xff]  ;;  %v89_v35 = vld [vmem:[#allocation5 + $0x28] sm:$0xff] }
  0x41   :  { %126 = vmatprep.subr.mxu0 %v105_v11  ;;  %461 = vmatpush3.msra.mxu1 %v209_v22  ;;  %v88_v36 = vld [vmem:[#allocation5 + $0x20] sm:$0xff]  ;;  %v204_v37 = vld [vmem:[#allocation7 + $0x38] sm:$0xff]  ;;  %v86_v39 = vld [vmem:[#allocation5 + $0x10] sm:$0xff] }
  0x42   :  { %127 = vmatpush1.msra.mxu0 %v104_v12  ;;  %462 = vmatprep.subr.mxu1 %v674_v0  ;;  %v87_v38 = vld [vmem:[#allocation5 + $0x18] sm:$0xff]  ;;  %v203_v40 = vld [vmem:[#allocation7 + $0x30] sm:$0xff]  ;;  %v85_v41 = vld [vmem:[#allocation5 + $0x8] sm:$0xff] }
  0x43   :  { %128 = vmatprep.subr.mxu0 %v103_v13  ;;  %463 = vmatpush3.msra.mxu1 %v208_v25  ;;  %v84_v42 = vld [vmem:[#allocation5] sm:$0xff]  ;;  %v202_v43 = vld [vmem:[#allocation7 + $0x28] sm:$0xff]  ;;  %v83_v44 = vld [vmem:[#allocation2] sm:$0xff] }
  0x44   :  { %129 = vmatpush1.msra.mxu0 %v102_v14  ;;  %464 = vmatprep.subr.mxu1 %v674_v0  ;;  %v201_v45 = vld [vmem:[#allocation7 + $0x20] sm:$0xff]  ;;  %v200_v46 = vld [vmem:[#allocation7 + $0x18] sm:$0xff]  ;;  %v199_v47 = vld [vmem:[#allocation7 + $0x10] sm:$0xff] }
  0x45   :  { %130 = vmatprep.subr.mxu0 %v101_v17  ;;  %465 = vmatpush3.msra.mxu1 %v207_v28  ;;  %v198_v48 = vld [vmem:[#allocation7 + $0x8] sm:$0xff]  ;;  %v197_v49 = vld [vmem:[#allocation7] sm:$0xff]  ;;  %v307_v50 = vld [vmem:[#allocation8 + $0x78] sm:$0xff] }
  0x46   :  { %131 = vmatpush1.msra.mxu0 %v100_v18  ;;  %466 = vmatprep.subr.mxu1 %v674_v0  ;;  %v306_v51 = vld [vmem:[#allocation8 + $0x70] sm:$0xff]  ;;  %v305_v52 = vld [vmem:[#allocation8 + $0x68] sm:$0xff]  ;;  %v304_v53 = vld [vmem:[#allocation8 + $0x60] sm:$0xff] }
  0x47   :  { %132 = vmatprep.subr.mxu0 %v99_v20  ;;  %467 = vmatpush3.msra.mxu1 %v206_v31  ;;  %v303_v54 = vld [vmem:[#allocation8 + $0x58] sm:$0xff]  ;;  %v302_v55 = vld [vmem:[#allocation8 + $0x50] sm:$0xff]  ;;  %v301_v56 = vld [vmem:[#allocation8 + $0x48] sm:$0xff] }
  0x48   :  { %133 = vmatpush1.msra.mxu0 %v98_v21  ;;  %468 = vmatprep.subr.mxu1 %v674_v0  ;;  %v300_v57 = vld [vmem:[#allocation8 + $0x40] sm:$0xff]  ;;  %v299_v58 = vld [vmem:[#allocation8 + $0x38] sm:$0xff]  ;;  %v298_v59 = vld [vmem:[#allocation8 + $0x30] sm:$0xff] }
  0x49   :  { %134 = vmatprep.subr.mxu0 %v97_v23  ;;  %469 = vmatpush3.msra.mxu1 %v205_v34  ;;  %v297_v60 = vld [vmem:[#allocation8 + $0x28] sm:$0xff]  ;;  %v296_v61 = vld [vmem:[#allocation8 + $0x20] sm:$0xff]  ;;  %v417_v62 = vld [vmem:[%s787_s2] ss:$0 sm:$0xff] }
  0x4a   :  { %135 = vmatpush1.msra.mxu0 %v96_v24  ;;  %470 = vmatprep.subr.mxu1 %v674_v0  ;;  %v295_v3 = vld [vmem:[#allocation8 + $0x18] sm:$0xff]  ;;  %v294_v4 = vld [vmem:[#allocation8 + $0x10] sm:$0xff]  ;;  %v293_v5 = vld [vmem:[#allocation8 + $0x8] sm:$0xff] }
  0x4b   :  { %136 = vmatprep.subr.mxu0 %v95_v26  ;;  %471 = vmatpush3.msra.mxu1 %v204_v37  ;;  %v292_v6 = vld [vmem:[#allocation8] sm:$0xff]  ;;  %v418_v9 = vld [vmem:[%s789_s4] ss:$0 sm:$0xff] }
  0x4c   :  { %137 = vmatpush1.msra.mxu0 %v94_v27  ;;  %472 = vmatprep.subr.mxu1 %v674_v0 }
  0x4d   :  { %138 = vmatprep.subr.mxu0 %v93_v29  ;;  %473 = vmatpush3.msra.mxu1 %v203_v40 }
  0x4e   :  { %139 = vmatpush1.msra.mxu0 %v92_v30  ;;  %474 = vmatprep.subr.mxu1 %v674_v0 }
  0x4f   :  { %140 = vmatprep.subr.mxu0 %v91_v32  ;;  %475 = vmatpush3.msra.mxu1 %v202_v43 }
  0x50   :  { %141 = vmatpush1.msra.mxu0 %v90_v33  ;;  %476 = vmatprep.subr.mxu1 %v674_v0 }
  0x51   :  { %142 = vmatprep.subr.mxu0 %v89_v35  ;;  %477 = vmatpush3.msra.mxu1 %v201_v45 }
  0x52   :  { %143 = vmatpush1.msra.mxu0 %v88_v36  ;;  %478 = vmatprep.subr.mxu1 %v674_v0 }
  0x53   :  { %144 = vmatprep.subr.mxu0 %v87_v38  ;;  %479 = vmatpush3.msra.mxu1 %v200_v46 }
  0x54   :  { %145 = vmatpush1.msra.mxu0 %v86_v39  ;;  %480 = vmatprep.subr.mxu1 %v674_v0 }
  0x55   :  { %146 = vmatprep.subr.mxu0 %v85_v41  ;;  %481 = vmatpush3.msra.mxu1 %v199_v47 }
  0x56   :  { %147 = vmatpush1.msra.mxu0 %v84_v42  ;;  %482 = vmatprep.subr.mxu1 %v674_v0 }
  0x57   :  { %181 = vmatmul.mubr.f32.vlgmr.msra.gmra.mxu0 %v83_v44  ;;  %489 = vmatprep.subr.mxu0 %v674_v0 }
  0x58   :  { %483 = vmatpush3.msra.mxu1 %v198_v48  ;;  %521 = vmatprep.mubr.msk.f32.mxu0 %vm675_vm0, %v674_v0 }
  0x59   :  { %484 = vmatprep.subr.mxu1 %v674_v0  ;;  %490 = vmatpush3.msra.mxu0 %v307_v50 }
  0x5a   :  { %485 = vmatpush3.msra.mxu1 %v197_v49  ;;  %491 = vmatprep.subr.mxu0 %v674_v0 }
  0x5b   :  { %492 = vmatpush3.msra.mxu0 %v306_v51 }
  0x5c   :  { %493 = vmatprep.subr.mxu0 %v674_v0 }
  0x5d   :  { %494 = vmatpush3.msra.mxu0 %v305_v52 }
  0x5e   :  { %495 = vmatprep.subr.mxu0 %v674_v0 }
  0x5f   :  { %496 = vmatpush3.msra.mxu0 %v304_v53 }
  0x60   :  { %497 = vmatprep.subr.mxu0 %v674_v0 }
  0x61   :  { %498 = vmatpush3.msra.mxu0 %v303_v54 }
  0x62   :  { %499 = vmatprep.subr.mxu0 %v674_v0 }
  0x63   :  { %500 = vmatpush3.msra.mxu0 %v302_v55 }
  0x64   :  { %501 = vmatprep.subr.mxu0 %v674_v0 }
  0x65   :  { %502 = vmatpush3.msra.mxu0 %v301_v56 }
  0x66   :  { %503 = vmatprep.subr.mxu0 %v674_v0 }
  0x67   :  { %504 = vmatpush3.msra.mxu0 %v300_v57 }
  0x68   :  { %505 = vmatprep.subr.mxu0 %v674_v0 }
  0x69   :  { %506 = vmatpush3.msra.mxu0 %v299_v58 }
  0x6a   :  { %507 = vmatprep.subr.mxu0 %v674_v0 }
  0x6b   :  { %508 = vmatpush3.msra.mxu0 %v298_v59 }
  0x6c   :  { %509 = vmatprep.subr.mxu0 %v674_v0 }
  0x6d   :  { %510 = vmatpush3.msra.mxu0 %v297_v60 }
  0x6e   :  { %511 = vmatprep.subr.mxu0 %v674_v0 }
  0x6f   :  { %512 = vmatpush3.msra.mxu0 %v296_v61 }
  0x70   :  { %513 = vmatprep.subr.mxu0 %v674_v0 }
  0x71   :  { %514 = vmatpush3.msra.mxu0 %v295_v3 }
  0x72   :  { %515 = vmatprep.subr.mxu0 %v674_v0 }
  0x73   :  { %516 = vmatpush3.msra.mxu0 %v294_v4 }
  0x74   :  { %517 = vmatprep.subr.mxu0 %v674_v0 }
  0x75   :  { %518 = vmatpush3.msra.mxu0 %v293_v5 }
  0x76   :  { %519 = vmatprep.subr.mxu0 %v674_v0 }
  0x77   :  { %520 = vmatpush3.msra.mxu0 %v292_v6 }
 0x117   :  { %v182_v63 = vpop.f32.mrf.mxu0 }
 0x118   :  { %v194_v1 = vadd.f32 %v417_v62, %v182_v63 }
 0x119   :  { %v184_v7 = vpop.f32.mrf.mxu0 }
 0x11a   :  { %v195_v2 = vmax.f32 %v194_v1, 0.0 }
 0x11c   :  { %196 = vst [vmem:[#allocation10] sm:$0xff] %v195_v2  ;;  %487 = vmatmul.mubr.f32.vlgmr.msra.gmra.mxu1 %v195_v2 }
 0x1dc   :  { %v279_v8 = vpop.f32.mrf.mxu1 }
 0x1dd   :  { %v280_v10 = vadd.f32 %v279_v8, %v184_v7 }
 0x1de   :  { %v488_v11 = vpop.f32.mrf.mxu1 }
 0x1df   :  { %v290_v12 = vadd.f32 %v418_v9, %v280_v10 }
 0x1e1   :  { %v291_v13 = vmax.f32 %v290_v12, 0.0 }
 0x1e3   :  { %522 = vmatmul.mubr.f32.vlgmr.msra.gmra.mxu0 %v291_v13 }
 0x1e4   :  { %627 = shalt.err (!%p624_p10)
}
 0x1e5   :  { %395 = dma.vmem_to_hbm [thread:$0]  %s393_s29, 128, %s792_s7, [#allocation4]   ;;  %v419_v0 = vld [vmem:[%s791_s6] ss:$0 sm:$0xff] }
 0x1e6   :  { %s677_s12 = smov [#allocation11]  }
 0x1e7   :  { %s402_s13 = sshll.u32 %s677_s12, 4  ;;  %s403_s13 = int_to_ptr.vmem [resolvable:$true] %s402_s13 }
 0x1e8   :  { %s636_s14 = scalar_lea.vmem %s403_s13, 128  ;;  %p641_p12 = scmp.lt.s32.totalorder %s403_s13, %s403_s13 }
 0x1e9   :  { %p637_p11 = scmp.ne.s32.totalorder %s403_s13, %s636_s14  ;;  %p642_p13 = scmp.lt.s32.totalorder %s636_s14, %s636_s14 }
 0x1eb   :  { %p643_p0 = por %p642_p13, %p641_p12 }
 0x1ed   :  { %p644_p1 = pnand %p643_p0, %p637_p11 }
 0x2a3   :  { %v381_v14 = vpop.f32.mrf.mxu0 }
 0x2a4   :  { %v382_v15 = vadd.f32 %v419_v0, %v381_v14 }
 0x2a5   :  { %v523_v16 = vpop.f32.mrf.mxu0 }
 0x2a6   :  { %385 = vst [vmem:[#allocation11] sm:$0xff] %v382_v15 }
 0x2a7   :  { %647 = shalt.err (!%p644_p1)
}
 0x2a8   :  { %405 = dma.vmem_to_hbm [thread:$0]  %s403_s13, 128, %s793_s8, [#allocation12]  }
 0x2a9   :  { %662 = dma.done.wait [#allocation4], 128  }
 0x2aa   :  { %663 = vsyncadd [#allocation4], 4294967168 }
 0x2ab   :  { %664 = dma.done.wait [#allocation12], 128  }
 0x2ac   :  { %665 = vsyncadd [#allocation12], 4294967168 }
 0x2ad   :  { %412 = vsyncpa [#allocation3], 1 }
 0x2ae   :  { %413 = vsyncpa [#allocation6], 1 }
 0x2af   :  { %414 = vsyncpa [#allocation9], 1 }
 0x2b0   :  { %415 = vsyncpa [#allocation4], 1 }
 0x2b1   :  { %416 = vsyncpa [#allocation12], 1 }

</bundles_post_ra>
